<compile_context>
chip_gen: v6e
topology: v6e:2x2x1
jax: 0.10.0
libtpu: 0.0.40
codegen_flags: <defaults>
</compile_context>

<pallas_src>
import functools

import jax
import jax.numpy as jnp
from jax.experimental import pallas as pl
from jax.experimental.pallas import tpu as pltpu

_EPS = 1e-8
_VMEM_STREAM_BUDGET = 32 * 1024 * 1024      # target bytes for all double-buffered streams
_VMEM_LIMIT_BYTES = 48 * 1024 * 1024        # scoped-VMEM cap passed to Mosaic (fits every gen)


# ----------------------------------------------------------------------------------------
# Fused kernel: logit(probs) from logits (tiny) + elementwise concrete-Bernoulli mask+apply.
# ----------------------------------------------------------------------------------------
def _concrete_kernel(logits_ref, x_ref, u_ref, o_ref, *maybe_m, inv_temperature, emit_mask):
    # logit(clamp(sum_k softmax(logits/T, axis=1), max=1)) — (K, D) work, recomputed per
    # batch tile. This keeps the whole op a single launch and is safe when the grid axis
    # is sharded across TensorCores (no cross-core scratch initialization needed).
    logits = logits_ref[...].astype(jnp.float32) * inv_temperature        # (K, D)
    mx = jnp.max(logits, axis=1, keepdims=True)                           # (K, 1)
    e = jnp.exp(logits - mx)                                              # (K, D)
    p = e / jnp.sum(e, axis=1, keepdims=True)                             # softmax over input_size
    probs = jnp.minimum(jnp.sum(p, axis=0, keepdims=True), 1.0)           # (1, D)
    logit_p = jnp.log((probs + _EPS) / (1.0 - probs + _EPS))              # single log

    # Concrete-Bernoulli mask and apply — pure elementwise streaming work.
    u = jnp.clip(u_ref[...].astype(jnp.float32), _EPS, 1.0 - _EPS)        # (TB, D)
    logit_u = jnp.log(u / (1.0 - u))                                      # one log + one recip
    z = (logit_p + logit_u) * inv_temperature
    m = 0.5 * (jnp.tanh(0.5 * z) + 1.0)                                   # sigmoid via tanh: 1 EUP op
    o_ref[...] = (x_ref[...].astype(jnp.float32) * m).astype(o_ref.dtype)
    if emit_mask:
        maybe_m[0][...] = m.astype(maybe_m[0].dtype)


# ----------------------------------------------------------------------------------------
# Tile chooser: biggest batch tile that keeps double-buffered streams ~<= 32 MiB, respects
# sublane packing for the x/out dtype, and leaves >= 2 grid steps for v7x's two TensorCores.
# ----------------------------------------------------------------------------------------
def _choose_batch_tile(B, bytes_per_row, pack):
    tb = max(pack, _VMEM_STREAM_BUDGET // (2 * max(bytes_per_row, 1)))    # 2x = double buffering
    if B > pack:
        # Guarantee >= 2 grid steps (megacore on v7x); prefer >= 4 if tiles stay >= 4 MiB.
        half = -(-B // 2)
        quarter = -(-B // 4)
        cap = quarter if quarter * bytes_per_row >= (4 << 20) else half
        tb = min(tb, cap)
    if tb >= B:
        return B                                                          # full-extent block (always legal)
    return max(pack, (tb // pack) * pack)                                 # sublane-dense tiles


def concrete_new_forward(x, logits, u=None, temperature=10.0, return_mask=False, key=None):
    """Pallas implementation of ConcreteNew.forward (n_samples=None, append=False).

    If `u` is None the uniform noise is drawn with jax.random (using `key`) and streamed to
    the kernel; passing an explicit `u` of shape (B, D) makes the result bit-comparable with
    the pure-JAX reference using the same noise.
    """
    x = jnp.asarray(x)
    logits = jnp.asarray(logits)
    B, D = x.shape
    K, D2 = logits.shape
    assert D == D2, "logits second dim must match input_size"

    if u is None:
        if key is None:
            key = jax.random.PRNGKey(0)
        u = jax.random.uniform(key, (B, D), dtype=jnp.float32)
    else:
        u = jnp.asarray(u)
        assert u.shape == (B, D)

    inv_t = 1.0 / float(temperature)
    itemsize = jnp.dtype(x.dtype).itemsize
    pack = max(8, 32 // itemsize)                                         # 8 f32, 16 bf16, 32 int8
    # Streams per batch row: x (read), u (read, f32), out (write) [+ mask (write)].
    bytes_per_row = D * (itemsize + 4 + itemsize + (itemsize if return_mask else 0))

    TB = _choose_batch_tile(B, bytes_per_row, pack)
    n_tiles = pl.cdiv(B, TB)                                              # ragged last tile is fine
    mask_dtype = x.dtype

    out_shape = jax.ShapeDtypeStruct((B, D), x.dtype)
    xmap = lambda i: (i, 0)
    lmap = lambda i: (0, 0)                                               # logits block stays resident
    if return_mask:
        out_shapes = (out_shape, jax.ShapeDtypeStruct((B, D), mask_dtype))
        out_specs = (pl.BlockSpec((TB, D), xmap), pl.BlockSpec((TB, D), xmap))
    else:
        out_shapes = out_shape
        out_specs = pl.BlockSpec((TB, D), xmap)

    kernel = functools.partial(_concrete_kernel, inv_temperature=inv_t, emit_mask=return_mask)

    result = pl.pallas_call(
        kernel,
        out_shape=out_shapes,
        grid=(n_tiles,),
        in_specs=[pl.BlockSpec((K, D), lmap),      # full-extent (K, D): legal for any K, D
                  pl.BlockSpec((TB, D), xmap),     # x
                  pl.BlockSpec((TB, D), xmap)],    # u
        out_specs=out_specs,
        compiler_params=pltpu.CompilerParams(
            dimension_semantics=("parallel",),
            vmem_limit_bytes=_VMEM_LIMIT_BYTES,
        ),
    )(logits, x, u)

    if return_mask:
        return result[0], result[1]
    return result


def _reference_forward(x, logits, u, temperature):
    """Pure-JAX reference of the same math (matches the PyTorch module)."""
    p = jax.nn.softmax(logits / temperature, axis=1)
    probs = jnp.minimum(jnp.sum(p, axis=0), 1.0)
    uc = jnp.clip(u, _EPS, 1.0 - _EPS)
    logit_p = jnp.log(probs + _EPS) - jnp.log(1.0 - probs + _EPS)
    logit_u = jnp.log(uc) - jnp.log(1.0 - uc)
    m = jax.nn.sigmoid((logit_p + logit_u) / temperature)
    return x * m, m


if __name__ == "__main__":
    temperature = 10.0
    key = jax.random.PRNGKey(0)
    k_x, k_l, k_u, k_x2, k_l2, k_u2 = jax.random.split(key, 6)

    # Case 1: aligned shapes consistent with the module (batch=8, input_size=128, k=4).
    B, D, K = 8, 128, 4
    x = jax.random.normal(k_x, (B, D), dtype=jnp.float32)
    logits = jax.random.normal(k_l, (K, D), dtype=jnp.float32)            # torch.randn-equivalent init
    u = jax.random.uniform(k_u, (B, D), dtype=jnp.float32, minval=1e-6, maxval=1.0 - 1e-6)

    out, mask = jax.block_until_ready(
        concrete_new_forward(x, logits, u=u, temperature=temperature, return_mask=True))
    ref_out, ref_mask = _reference_forward(x, logits, u, temperature)
    assert out.shape == (B, D) and mask.shape == (B, D)
    assert jnp.allclose(out, ref_out, atol=2e-5, rtol=1e-4), "output mismatch vs reference"
    assert jnp.allclose(mask, ref_mask, atol=2e-5, rtol=1e-4), "mask mismatch vs reference"

    # Output-only compiled variant (no mask writeback to HBM).
    out_only = jax.block_until_ready(concrete_new_forward(x, logits, u=u, temperature=temperature))
    assert jnp.allclose(out_only, ref_out, atol=2e-5, rtol=1e-4), "output-only variant mismatch"

    # Case 2: ragged shapes (batch / feature dims not multiples of 8 / 128) exercise the
    # cdiv grid (masked last-tile stores) and full-D blocks with no wrapper padding.
    B2, D2, K2 = 37, 100, 5
    x2 = jax.random.normal(k_x2, (B2, D2), dtype=jnp.float32)
    logits2 = jax.random.normal(k_l2, (K2, D2), dtype=jnp.float32)
    u2 = jax.random.uniform(k_u2, (B2, D2), dtype=jnp.float32, minval=1e-6, maxval=1.0 - 1e-6)
    out2, mask2 = jax.block_until_ready(
        concrete_new_forward(x2, logits2, u=u2, temperature=5.0, return_mask=True))
    ref_out2, ref_mask2 = _reference_forward(x2, logits2, u2, 5.0)
    assert jnp.allclose(out2, ref_out2, atol=2e-5, rtol=1e-4), "ragged output mismatch"
    assert jnp.allclose(mask2, ref_mask2, atol=2e-5, rtol=1e-4), "ragged mask mismatch"

    # Case 3: default path where the wrapper draws the uniform noise itself.
    # TODO(synk): on-chip noise via pltpu.prng_* would avoid the (B, D) HBM read of u, but
    # prng_seed has no interpret/CPU lowering, so noise is drawn with jax.random instead.
    out3 = jax.block_until_ready(
        concrete_new_forward(x, logits, temperature=temperature, key=jax.random.PRNGKey(7)))
    assert out3.shape == (B, D)
    assert bool(jnp.all(jnp.isfinite(out3)))
    assert bool(jnp.all(jnp.abs(out3) <= jnp.abs(x) + 1e-6))              # mask values lie in (0, 1)

    print("KERNEL_OK")
</pallas_src>

<mosaic_0001>
module attributes {stable_mosaic.version = 11 : i64} {
  func.func @_concrete_kernel(%arg0: i32, %arg1: memref<4x128xf32, #tpu.memory_space<vmem>>, %arg2: memref<8x128xf32, #tpu.memory_space<vmem>>, %arg3: memref<8x128xf32, #tpu.memory_space<vmem>>, %arg4: memref<8x128xf32, #tpu.memory_space<vmem>>, %arg5: memref<8x128xf32, #tpu.memory_space<vmem>>) attributes {dimension_semantics = [#tpu.dimension_semantics<parallel>], iteration_bounds = array<i64: 1>, scalar_prefetch = 0 : i64, scratch_operands = 0 : i64, tpu.core_type = #tpu.core_type<tc>, window_params = [{pipeline_mode = #tpu.pipeline_mode<synchronous>, transform_indices = @transform_0, window_bounds = array<i64: 4, 128>}, {transform_indices = @transform_1, window_bounds = array<i64: 8, 128>}, {transform_indices = @transform_2, window_bounds = array<i64: 8, 128>}, {transform_indices = @transform_3, window_bounds = array<i64: 8, 128>}, {transform_indices = @transform_4, window_bounds = array<i64: 8, 128>}]} {
    %c0 = arith.constant 0 : index
    %c0_0 = arith.constant 0 : index
    %0 = vector.load %arg1[%c0, %c0_0] : memref<4x128xf32, #tpu.memory_space<vmem>>, vector<4x128xf32>
    %cst = arith.constant 1.000000e-01 : f32
    %1 = vector.broadcast %cst : f32 to vector<4x128xf32>
    %2 = arith.mulf %0, %1 : vector<4x128xf32>
    %cst_1 = arith.constant dense<0xFF800000> : vector<4xf32>
    %3 = vector.multi_reduction <maximumf>, %2, %cst_1 [1] : vector<4x128xf32> to vector<4xf32>
    %4 = vector.shape_cast %3 : vector<4xf32> to vector<4x1xf32>
    %5 = vector.broadcast %4 : vector<4x1xf32> to vector<4x128xf32>
    %6 = arith.subf %2, %5 : vector<4x128xf32>
    %7 = math.exp %6 : vector<4x128xf32>
    %cst_2 = arith.constant dense<0.000000e+00> : vector<4xf32>
    %8 = vector.multi_reduction <add>, %7, %cst_2 [1] : vector<4x128xf32> to vector<4xf32>
    %9 = vector.shape_cast %8 : vector<4xf32> to vector<4x1xf32>
    %10 = vector.broadcast %9 : vector<4x1xf32> to vector<4x128xf32>
    %11 = arith.divf %7, %10 : vector<4x128xf32>
    %cst_3 = arith.constant dense<0.000000e+00> : vector<128xf32>
    %12 = vector.multi_reduction <add>, %11, %cst_3 [0] : vector<4x128xf32> to vector<128xf32>
    %13 = vector.shape_cast %12 : vector<128xf32> to vector<1x128xf32>
    %cst_4 = arith.constant 1.000000e+00 : f32
    %14 = vector.broadcast %cst_4 : f32 to vector<1x128xf32>
    %15 = arith.minimumf %13, %14 : vector<1x128xf32>
    %cst_5 = arith.constant 9.99999993E-9 : f32
    %16 = vector.broadcast %cst_5 : f32 to vector<1x128xf32>
    %17 = arith.addf %15, %16 : vector<1x128xf32>
    %cst_6 = arith.constant 1.000000e+00 : f32
    %18 = vector.broadcast %cst_6 : f32 to vector<1x128xf32>
    %19 = arith.subf %18, %15 : vector<1x128xf32>
    %cst_7 = arith.constant 9.99999993E-9 : f32
    %20 = vector.broadcast %cst_7 : f32 to vector<1x128xf32>
    %21 = arith.addf %19, %20 : vector<1x128xf32>
    %22 = arith.divf %17, %21 : vector<1x128xf32>
    %23 = math.log %22 : vector<1x128xf32>
    %c0_8 = arith.constant 0 : index
    %c0_9 = arith.constant 0 : index
    %24 = vector.load %arg3[%c0_8, %c0_9] : memref<8x128xf32, #tpu.memory_space<vmem>>, vector<8x128xf32>
    %cst_10 = arith.constant 9.99999993E-9 : f32
    %cst_11 = arith.constant 1.000000e+00 : f32
    %25 = vector.broadcast %cst_10 : f32 to vector<8x128xf32>
    %26 = arith.maximumf %25, %24 : vector<8x128xf32>
    %27 = vector.broadcast %cst_11 : f32 to vector<8x128xf32>
    %28 = arith.minimumf %27, %26 : vector<8x128xf32>
    %cst_12 = arith.constant 1.000000e+00 : f32
    %29 = vector.broadcast %cst_12 : f32 to vector<8x128xf32>
    %30 = arith.subf %29, %28 : vector<8x128xf32>
    %31 = arith.divf %28, %30 : vector<8x128xf32>
    %32 = math.log %31 : vector<8x128xf32>
    %33 = vector.broadcast %23 : vector<1x128xf32> to vector<8x128xf32>
    %34 = arith.addf %33, %32 : vector<8x128xf32>
    %cst_13 = arith.constant 1.000000e-01 : f32
    %35 = vector.broadcast %cst_13 : f32 to vector<8x128xf32>
    %36 = arith.mulf %34, %35 : vector<8x128xf32>
    %cst_14 = arith.constant 5.000000e-01 : f32
    %37 = vector.broadcast %cst_14 : f32 to vector<8x128xf32>
    %38 = arith.mulf %37, %36 : vector<8x128xf32>
    %39 = math.tanh %38 : vector<8x128xf32>
    %cst_15 = arith.constant 1.000000e+00 : f32
    %40 = vector.broadcast %cst_15 : f32 to vector<8x128xf32>
    %41 = arith.addf %39, %40 : vector<8x128xf32>
    %cst_16 = arith.constant 5.000000e-01 : f32
    %42 = vector.broadcast %cst_16 : f32 to vector<8x128xf32>
    %43 = arith.mulf %42, %41 : vector<8x128xf32>
    %c0_17 = arith.constant 0 : index
    %c0_18 = arith.constant 0 : index
    %44 = vector.load %arg2[%c0_17, %c0_18] : memref<8x128xf32, #tpu.memory_space<vmem>>, vector<8x128xf32>
    %45 = arith.mulf %44, %43 : vector<8x128xf32>
    %c0_19 = arith.constant 0 : index
    %c0_20 = arith.constant 0 : index
    %46 = vector.load %arg4[%c0_19, %c0_20] : memref<8x128xf32, #tpu.memory_space<vmem>>, vector<8x128xf32>
    tpu.vector_store %arg4[%c0_19, %c0_20], %45 {strides = array<i32>} : memref<8x128xf32, #tpu.memory_space<vmem>>, vector<8x128xf32>,
    %c0_21 = arith.constant 0 : index
    %c0_22 = arith.constant 0 : index
    %47 = vector.load %arg5[%c0_21, %c0_22] : memref<8x128xf32, #tpu.memory_space<vmem>>, vector<8x128xf32>
    tpu.vector_store %arg5[%c0_21, %c0_22], %43 {strides = array<i32>} : memref<8x128xf32, #tpu.memory_space<vmem>>, vector<8x128xf32>,
    return
  }
  func.func @transform_0(%arg0: i32) -> (i32, i32) {
    %c0_i32 = arith.constant 0 : i32
    %c0_i32_0 = arith.constant 0 : i32
    %c0_i32_1 = arith.constant 0 : i32
    return %c0_i32, %c0_i32_0 : i32, i32
  }
  func.func @transform_1(%arg0: i32) -> (i32, i32) {
    %c0_i32 = arith.constant 0 : i32
    %c0_i32_0 = arith.constant 0 : i32
    return %arg0, %c0_i32 : i32, i32
  }
  func.func @transform_2(%arg0: i32) -> (i32, i32) {
    %c0_i32 = arith.constant 0 : i32
    %c0_i32_0 = arith.constant 0 : i32
    return %arg0, %c0_i32 : i32, i32
  }
  func.func @transform_3(%arg0: i32) -> (i32, i32) {
    %c0_i32 = arith.constant 0 : i32
    %c0_i32_0 = arith.constant 0 : i32
    return %arg0, %c0_i32 : i32, i32
  }
  func.func @transform_4(%arg0: i32) -> (i32, i32) {
    %c0_i32 = arith.constant 0 : i32
    %c0_i32_0 = arith.constant 0 : i32
    return %arg0, %c0_i32 : i32, i32
  }
}

</mosaic_0001>

<bundles_post_ra>
// kernel: tpu_custom_call.1
= control target key start
LH: loop header
LB: loop body
LE: loop exit
PB: predicated region body
PF: predicated region fallthrough
CT: control target
= control target key end

     0   :  { %10 = vsyncpa [#allocation3], 0  ;;  %s305_s0 = inlined_call_operand.hbm [shape: f32[4,128], index: 0, kind: input, shape index: {}]   ;;  %s306_s1 = inlined_call_operand.hbm [shape: f32[8,128], index: 1, kind: input, shape index: {}]   ;;  %s307_s2 = inlined_call_operand.hbm [shape: f32[8,128], index: 2, kind: input, shape index: {}]   ;;  %s308_s3 = inlined_call_operand.hbm [shape: f32[8,128], index: 3, kind: output, shape index: {0}]   ;;  %s309_s4 = inlined_call_operand.hbm [shape: f32[8,128], index: 4, kind: output, shape index: {1}]  }
   0x1   :  { %11 = vsyncpa [#allocation6], 0 }
   0x2   :  { %12 = vsyncpa [#allocation4], 0 }
   0x3   :  { %13 = vsyncpa [#allocation10], 0  ;;  %s257_s15 = smov [#allocation5]   ;;  %s258_s17 = smov [#allocation2]  }
   0x4   :  { %s30_s16 = sshll.u32 %s257_s15, 4  ;;  %s20_s18 = sshll.u32 %s258_s17, 4  ;;  %s31_s16 = int_to_ptr.vmem [resolvable:$true] %s30_s16  ;;  %s21_s18 = int_to_ptr.vmem [resolvable:$true] %s20_s18 }
   0x5   :  { %s157_s19 = scalar_lea.vmem %s31_s16, 128  ;;  %p162_p1 = scmp.lt.s32.totalorder %s31_s16, %s31_s16 }
   0x6   :  { %p158_p0 = scmp.ne.s32.totalorder %s31_s16, %s157_s19  ;;  %p163_p2 = scmp.lt.s32.totalorder %s157_s19, %s157_s19 }
   0x8   :  { %p164_p3 = por %p163_p2, %p162_p1 }
   0xa   :  { %p165_p4 = pnand %p164_p3, %p158_p0 }
   0xc   :  { %168 = shalt.err (!%p165_p4)
}
   0xd   :  { %33 = dma.hbm_to_vmem [thread:$0]  %s306_s1, 128, %s31_s16, [#allocation6]  }
   0xe   :  { %s177_s22 = scalar_lea.vmem %s21_s18, 64  ;;  %p182_p6 = scmp.lt.s32.totalorder %s21_s18, %s21_s18 }
   0xf   :  { %p178_p5 = scmp.ne.s32.totalorder %s21_s18, %s177_s22  ;;  %p183_p7 = scmp.lt.s32.totalorder %s177_s22, %s177_s22 }
  0x11   :  { %p184_p8 = por %p183_p7, %p182_p6 }
  0x13   :  { %p185_p9 = pnand %p184_p8, %p178_p5 }
  0x15   :  { %188 = shalt.err (!%p185_p9)
}
  0x16   :  { %23 = dma.hbm_to_vmem [thread:$0]  %s305_s0, 64, %s21_s18, [#allocation3]  }
  0x17   :  { %s259_s25 = smov [#allocation7]  }
  0x18   :  { %s40_s26 = sshll.u32 %s259_s25, 4  ;;  %s41_s26 = int_to_ptr.vmem [resolvable:$true] %s40_s26 }
  0x19   :  { %s197_s27 = scalar_lea.vmem %s41_s26, 128  ;;  %p202_p11 = scmp.lt.s32.totalorder %s41_s26, %s41_s26 }
  0x1a   :  { %p198_p10 = scmp.ne.s32.totalorder %s41_s26, %s197_s27  ;;  %p203_p12 = scmp.lt.s32.totalorder %s197_s27, %s197_s27 }
  0x1c   :  { %p204_p13 = por %p203_p12, %p202_p11 }
  0x1e   :  { %p205_p0 = pnand %p204_p13, %p198_p10 }
  0x20   :  { %208 = shalt.err (!%p205_p0)
}
  0x21   :  { %43 = dma.hbm_to_vmem [thread:$0]  %s307_s2, 128, %s41_s26, [#allocation6]  }
  0x22   :  { %249 = dma.done.wait [#allocation3], 64  }
  0x23   :  { %250 = vsyncadd [#allocation3], 4294967232 }
  0x24   :  { %251 = dma.done.wait [#allocation6], 256  }
  0x25   :  { %252 = vsyncadd [#allocation6], 4294967040  ;;  %v53_v0 = vld [vmem:[#allocation2] sm:$0xf]  ;;  %vm55_vm0 = vcmask 1043456   ;;  %v82_v9 = vld [vmem:[#allocation7] sm:$0xff] }
  0x26   :  { %v54_v1 = vmul.f32 0.1, %v53_v0  ;;  %v83_v12 = vmax.f32 %v82_v9, 1e-08  ;;  %s260_s0 = smov [#allocation9]   ;;  %v96_v39 = vld [vmem:[#allocation5] sm:$0xff] }
  0x27   :  { %s116_s2 = sshll.u32 %s260_s0, 4  ;;  %s261_s29 = smov [#allocation8]   ;;  %s117_s2 = int_to_ptr.vmem [resolvable:$true] %s116_s2 }
  0x28   :  { %v56_v2 = vsel %vm55_vm0, %v54_v1, -inf  ;;  %v84_v16 = vmin.f32 %v83_v12, 1.0  ;;  %s106_s30 = sshll.u32 %s261_s29, 4  ;;  %s209_s5 = scalar_lea.vmem %s117_s2, 128  ;;  %s107_s30 = int_to_ptr.vmem [resolvable:$true] %s106_s30 }
  0x29   :  { %57 = vmax.xlane.f32.xlu0 %v56_v2  ;;  %p210_p1 = scmp.ne.s32.totalorder %s117_s2, %s209_s5  ;;  %p214_p2 = scmp.lt.s32.totalorder %s117_s2, %s117_s2 }
  0x2a   :  { %v85_v19 = vsub.f32 1.0, %v84_v16  ;;  %p215_p3 = scmp.lt.s32.totalorder %s209_s5, %s209_s5 }
  0x2c   :  { %p216_p4 = por %p215_p3, %p214_p2 }
  0x2e   :  { %p217_p5 = pnand %p216_p4, %p210_p1 }
  0xb2   :  { %v58_v3 = vpop.xlane.xlu0 %57 }
  0xb3   :  { %v59_v4 = vsub.f32 %v54_v1, %v58_v3 }
  0xb5   :  { %v60_v5 = vmul.f32 1.442695, %v59_v4 }
  0xb7   :  { %135 = vpow2.f32 %v60_v5 }
  0xc4   :  { %v136_v6 = vpop.eup %135 }
  0xc5   :  { %v62_v7 = vsel %vm55_vm0, %v136_v6, 0.0 }
  0xc6   :  { %63 = vadd.xlane.f32.xlu0 %v62_v7 }
 0x14f   :  { %v64_v8 = vpop.xlane.xlu0 %63 }
 0x150   :  { %137 = vrcp.f32 %v64_v8 }
 0x151   :  { %139 = vrcp.f32 %v85_v19 }
 0x15d   :  { %v138_v10 = vpop.eup %137 }
 0x15e   :  { %v66_v11 = vmul.f32 %v138_v10, %v136_v6  ;;  %v140_v25 = vpop.eup %139 }
 0x15f   :  { %v87_v26 = vmul.f32 %v140_v25, %v84_v16 }
 0x160   :  { %v67_v13 = vsel %vm55_vm0, %v66_v11, 0.0 }
 0x161   :  { %v68_v14 = vrot.slane %v67_v13, 4 }
 0x163   :  { %v69_v15 = vadd.f32 %v68_v14, %v67_v13 }
 0x165   :  { %v70_v17 = vrot.slane %v69_v15, 2 }
 0x167   :  { %v71_v18 = vadd.f32 %v70_v17, %v69_v15 }
 0x169   :  { %v72_v20 = vrot.slane %v71_v18, 1 }
 0x16b   :  { %v73_v21 = vadd.f32 %v72_v20, %v71_v18 }
 0x16d   :  { %v74_v22 = vmin.f32 %v73_v21, 1.0 }
 0x16f   :  { %v76_v23 = vsub.f32 1.0, %v74_v22  ;;  %v75_v27 = vadd.f32 1e-08, %v74_v22 }
 0x171   :  { %v77_v24 = vadd.f32 1e-08, %v76_v23 }
 0x173   :  { %141 = vrcp.f32 %v77_v24 }
 0x174   :  { %143 = vlog2.f32 %v87_v26 }
 0x180   :  { %v142_v28 = vpop.eup %141 }
 0x181   :  { %v79_v29 = vmul.f32 %v142_v28, %v75_v27  ;;  %v144_v30 = vpop.eup %143 }
 0x182   :  { %v89_v31 = vmul.f32 0.6931472, %v144_v30 }
 0x183   :  { %145 = vlog2.f32 %v79_v29 }
 0x190   :  { %v146_v32 = vpop.eup %145 }
 0x191   :  { %v81_v33 = vmul.f32 0.6931472, %v146_v32 }
 0x193   :  { %v90_v34 = vadd.f32 %v89_v31, %v81_v33 }
 0x195   :  { %v91_v35 = vmul.f32 0.1, %v90_v34 }
 0x197   :  { %v92_v36 = vmul.f32 0.5, %v91_v35 }
 0x199   :  { %147 = vtanh.f32 %v92_v36 }
 0x1a6   :  { %v148_v37 = vpop.eup %147 }
 0x1a7   :  { %v94_v38 = vadd.f32 1.0, %v148_v37 }
 0x1a9   :  { %v95_v40 = vmul.f32 0.5, %v94_v38 }
 0x1ab   :  { %v97_v41 = vmul.f32 %v96_v39, %v95_v40  ;;  %99 = vst [vmem:[#allocation9] sm:$0xff] %v95_v40 }
 0x1ac   :  { %220 = shalt.err (!%p217_p5)
}
 0x1ad   :  { %119 = dma.vmem_to_hbm [thread:$0]  %s117_s2, 128, %s309_s4, [#allocation10]   ;;  %98 = vst [vmem:[#allocation8] sm:$0xff] %v97_v41 }
 0x1ae   :  { %s229_s8 = scalar_lea.vmem %s107_s30, 128  ;;  %p234_p7 = scmp.lt.s32.totalorder %s107_s30, %s107_s30 }
 0x1af   :  { %p230_p6 = scmp.ne.s32.totalorder %s107_s30, %s229_s8  ;;  %p235_p8 = scmp.lt.s32.totalorder %s229_s8, %s229_s8 }
 0x1b1   :  { %p236_p9 = por %p235_p8, %p234_p7 }
 0x1b3   :  { %p237_p10 = pnand %p236_p9, %p230_p6 }
 0x1b5   :  { %240 = shalt.err (!%p237_p10)
}
 0x1b6   :  { %109 = dma.vmem_to_hbm [thread:$0]  %s107_s30, 128, %s308_s3, [#allocation4]  }
 0x1b7   :  { %253 = dma.done.wait [#allocation4], 128  }
 0x1b8   :  { %254 = vsyncadd [#allocation4], 4294967168 }
 0x1b9   :  { %255 = dma.done.wait [#allocation10], 128  }
 0x1ba   :  { %256 = vsyncadd [#allocation10], 4294967168 }
 0x1bb   :  { %126 = vsyncpa [#allocation3], 1 }
 0x1bc   :  { %127 = vsyncpa [#allocation6], 1 }
 0x1bd   :  { %128 = vsyncpa [#allocation4], 1 }
 0x1be   :  { %129 = vsyncpa [#allocation10], 1 }

</bundles_post_ra>
